<compile_context>
chip_gen: v7x
topology: tpu7x:2x2x1
jax: 0.10.0
libtpu: 0.0.40
codegen_flags: <defaults>
</compile_context>

<pallas_src>
import jax
import jax.numpy as jnp
from jax.experimental import pallas as pl
from jax.experimental.pallas import tpu as pltpu

LANE = 128
SUBLANE = 8


def lw_attention_kernel(x_ref, mb_ref, wcat_ref, batt_ref, fb_ref, o_ref):
    # x_ref:    (Bt*S_pad, H)   bf16  flattened activations
    # mb_ref:   (Bt, S_pad, 1)  bf16  additive mask bias (0 / -inf)
    # wcat_ref: (H, 2*TL)       bf16  [W_att tile ; final.weight tile]^T
    # batt_ref: (1, TL)         f32   U @ b_k  (this label tile)
    # fb_ref:   (1, TL)         f32   final bias (this label tile)
    # o_ref:    (Bt, TL)        f32
    Bt, S_pad, _ = mb_ref.shape
    TL = fb_ref.shape[1]

    # One MXU matmul yields both attention logits and the final projection.
    fused = jnp.dot(x_ref[...], wcat_ref[...],
                    preferred_element_type=jnp.float32)            # (Bt*S_pad, 2*TL)

    scores = (fused[:, :TL] + batt_ref[...]).reshape(Bt, S_pad, TL)
    scores = scores + mb_ref[...].astype(jnp.float32)              # mask: 0 / -inf
    proj = fused[:, TL:].reshape(Bt, S_pad, TL)                    # = x @ final.weight^T

    # Softmax over the sequence axis fused with the weighted-sum epilogue.
    m = jnp.max(scores, axis=1, keepdims=True)                     # (Bt, 1, TL)
    e = jnp.exp(scores - m)                                        # (Bt, S_pad, TL)
    denom = jnp.sum(e, axis=1)                                     # (Bt, TL)
    num = jnp.sum(e * proj, axis=1)                                # (Bt, TL)
    # Reciprocal applied after the S-reduction: only a (Bt, TL) tensor, so exact
    # division costs ~nothing and avoids the approx-reciprocal error.
    out = num / denom + fb_ref[...]
    o_ref[...] = jax.nn.sigmoid(out).astype(o_ref.dtype)


def prepare_lw_attention_params(u, fw, fb, wk=None, bk=None, *,
                                tile_l=512, compute_dtype=jnp.bfloat16):
    """One-time weight prep (off the per-call path).

    Precomposes U∘W_k:  W_att = U @ W_k, b_att = U @ b_k, and builds the fused,
    padded, pre-transposed RHS operand [W_att ; final.weight]^T laid out per
    label tile so a (H, 2*TL) block serves each grid step.
    Pass wk=None for the label_size=None configuration (then W_att = U)."""
    assert tile_l % LANE == 0
    L, H = fw.shape
    f32 = jnp.float32

    if wk is not None:
        watt = u.astype(f32) @ wk.astype(f32)                      # (L, H)
        batt = (u.astype(f32) @ bk.astype(f32)) if bk is not None else jnp.zeros((L,), f32)
    else:
        watt = u.astype(f32)
        batt = jnp.zeros((L,), f32)

    L_pad = pl.cdiv(L, LANE) * LANE
    if L_pad <= tile_l:
        TL = L_pad
    else:
        TL = tile_l
        L_pad = pl.cdiv(L_pad, TL) * TL
    nl = L_pad // TL

    watt_p = jnp.zeros((L_pad, H), f32).at[:L].set(watt)
    fw_p = jnp.zeros((L_pad, H), f32).at[:L].set(fw.astype(f32))
    # Per label tile, concatenate [W_att tile ; final.weight tile] so the kernel's
    # RHS block for tile l is the contiguous column range [l*2*TL, (l+1)*2*TL).
    wc = jnp.concatenate([watt_p.reshape(nl, TL, H), fw_p.reshape(nl, TL, H)], axis=1)
    wcat_t = wc.reshape(nl * 2 * TL, H).T.astype(compute_dtype)    # (H, nl*2*TL)

    batt_p = jnp.zeros((1, L_pad), f32).at[0, :L].set(batt)
    fb_p = jnp.zeros((1, L_pad), f32).at[0, :L].set(fb.astype(f32))

    return dict(wcat_t=wcat_t, batt=batt_p, fb=fb_p,
                L=L, L_pad=L_pad, TL=TL, H=H, compute_dtype=compute_dtype)


def _vmem_limit_bytes():
    # Generation-aware VMEM budget: ~48 MiB on v7x (64 MiB/TC), ~96 MiB on v5e/v6e.
    try:
        cap = pltpu.get_tpu_info().vmem_capacity_bytes
    except Exception:
        cap = 64 * 1024 * 1024
    return int(min(cap * 3 // 4, 100 * 1024 * 1024))


def _pick_batch_tile(B, S_pad, *, target_rows=512):
    # Feed the MXU >= target_rows LHS rows per grid step (amortizes the ~0.35us
    # per-step overhead and fills MXU rows).  Keep the output block sublane-legal:
    # Bt % 8 == 0 unless the block covers the whole (padded) batch.
    bt = max(1, target_rows // S_pad)
    if bt >= B:
        return B
    return max(SUBLANE, (bt // SUBLANE) * SUBLANE)


def lw_attention(x, masks, params, *, block_b=None, interpret=False):
    """x: (B, S, H) float; masks: (B, S) or None; params from
    prepare_lw_attention_params.  Returns (B, L) f32."""
    B, S, H = x.shape
    assert H == params["H"]
    L, L_pad, TL = params["L"], params["L_pad"], params["TL"]
    cdt = params["compute_dtype"]
    f32 = jnp.float32

    S_pad = pl.cdiv(S, SUBLANE) * SUBLANE
    Bt = _pick_batch_tile(B, S_pad) if block_b is None else min(block_b, B)
    Bp = pl.cdiv(B, Bt) * Bt
    nb = Bp // Bt
    nl = L_pad // TL

    # Activations: bf16 cast; pad only when actually required.
    xc = x.astype(cdt)
    if Bp != B or S_pad != S:
        xc = jnp.zeros((Bp, S_pad, H), cdt).at[:B, :S].set(xc)
    x_flat = xc.reshape(Bp * S_pad, H)

    # Additive mask bias: 0 where valid, -inf where masked.  Padded sequence rows
    # are masked out (-inf); padded batch rows stay all-valid so softmax is finite.
    neg_inf = jnp.float32(-jnp.inf)
    if masks is None:
        mrow = jnp.zeros((B, S), f32)
    else:
        mrow = jnp.where(masks.astype(f32) < 1.0, neg_inf, 0.0)
    mb = jnp.zeros((Bp, S_pad), f32).at[:B, :S].set(mrow)
    if S_pad != S:
        mb = mb.at[:B, S:].set(neg_inf)
    mbias = mb[:, :, None].astype(jnp.bfloat16)                    # halves mask DMA

    out = pl.pallas_call(
        lw_attention_kernel,
        out_shape=jax.ShapeDtypeStruct((Bp, L_pad), f32),
        grid_spec=pltpu.PrefetchScalarGridSpec(
            num_scalar_prefetch=0,
            # Label axis innermost: the x block stays resident across label tiles,
            # weight tiles stream.  Both axes are independent ("parallel") -> the
            # label axis also gives v7x's second TC work when nl > 1.
            grid=(nb, nl),
            in_specs=[
                pl.BlockSpec((Bt * S_pad, H), lambda b, l: (b, 0)),     # x (bf16)
                pl.BlockSpec((Bt, S_pad, 1), lambda b, l: (b, 0, 0)),   # mask bias
                pl.BlockSpec((H, 2 * TL), lambda b, l: (0, l)),         # [W_att;F]^T tile
                pl.BlockSpec((1, TL), lambda b, l: (0, l)),             # U @ b_k tile
                pl.BlockSpec((1, TL), lambda b, l: (0, l)),             # final bias tile
            ],
            out_specs=pl.BlockSpec((Bt, TL), lambda b, l: (b, l)),      # lane-dense out
        ),
        compiler_params=pltpu.CompilerParams(
            dimension_semantics=("parallel", "parallel"),
            vmem_limit_bytes=_vmem_limit_bytes(),
        ),
        interpret=interpret,
    )(x_flat, mbias, params["wcat_t"], params["batt"], params["fb"])

    return out[:B, :L]


if __name__ == "__main__":
    B, S, H = 2, 8, 32       # batch, seq, hidden
    L, LS = 5, 16            # labels_num, label_size

    key = jax.random.PRNGKey(0)
    keys = jax.random.split(key, 7)

    x = jax.random.normal(keys[0], (B, S, H), jnp.float32)
    masks = (jax.random.uniform(keys[1], (B, S)) > 0.2).astype(jnp.float32)
    masks = masks.at[:, 0].set(1.0)   # keep at least one valid position per row

    def uinit(k, shape, fan_in):
        bound = 1.0 / (fan_in ** 0.5)
        return jax.random.uniform(k, shape, jnp.float32, -bound, bound)

    wk = uinit(keys[2], (LS, H), H)      # W_k.weight
    bk = uinit(keys[3], (LS,), H)        # W_k.bias
    u = uinit(keys[4], (L, LS), LS)      # U.weight (no bias)
    fw = uinit(keys[5], (L, H), H)       # final.weight
    fb = uinit(keys[6], (L,), H)         # final.bias

    params = prepare_lw_attention_params(u, fw, fb, wk=wk, bk=bk)
    out = jax.block_until_ready(lw_attention(x, masks, params))

    # Plain-JAX f32 reference mirroring the PyTorch forward.
    k_ref = x @ wk.T + bk
    att_ref = k_ref @ u.T
    att_ref = jnp.where(masks[:, :, None] < 1.0, -jnp.inf, att_ref)
    att_ref = jax.nn.softmax(att_ref, axis=1)
    ctx_ref = jnp.einsum("bsl,bsh->blh", att_ref, x)
    ref = jax.nn.sigmoid(jnp.sum(fw[None] * ctx_ref, axis=2) + fb)

    assert out.shape == (B, L)
    # bf16 MXU operands -> slightly loosened tolerance (reciprocal is now exact).
    assert jnp.allclose(out, ref, atol=2e-2, rtol=2e-2), float(jnp.max(jnp.abs(out - ref)))
    print("KERNEL_OK")
</pallas_src>

<mosaic_0001>
module attributes {stable_mosaic.version = 11 : i64} {
  func.func @lw_attention_kernel(%arg0: i32, %arg1: i32, %arg2: memref<16x32xbf16, #tpu.memory_space<vmem>>, %arg3: memref<2x8x1xbf16, #tpu.memory_space<vmem>>, %arg4: memref<32x256xbf16, #tpu.memory_space<vmem>>, %arg5: memref<1x128xf32, #tpu.memory_space<vmem>>, %arg6: memref<1x128xf32, #tpu.memory_space<vmem>>, %arg7: memref<2x128xf32, #tpu.memory_space<vmem>>) attributes {dimension_semantics = [#tpu.dimension_semantics<parallel>, #tpu.dimension_semantics<parallel>], iteration_bounds = array<i64: 1, 1>, scalar_prefetch = 0 : i64, scratch_operands = 0 : i64, tpu.core_type = #tpu.core_type<tc>, window_params = [{transform_indices = @transform_0, window_bounds = array<i64: 16, 32>}, {transform_indices = @transform_1, window_bounds = array<i64: 2, 8, 1>}, {transform_indices = @transform_2, window_bounds = array<i64: 32, 256>}, {transform_indices = @transform_3, window_bounds = array<i64: 1, 128>}, {transform_indices = @transform_4, window_bounds = array<i64: 1, 128>}, {transform_indices = @transform_5, window_bounds = array<i64: 2, 128>}]} {
    %c0 = arith.constant 0 : index
    %c0_0 = arith.constant 0 : index
    %0 = vector.load %arg2[%c0, %c0_0] : memref<16x32xbf16, #tpu.memory_space<vmem>>, vector<16x32xbf16>
    %c0_1 = arith.constant 0 : index
    %c0_2 = arith.constant 0 : index
    %1 = vector.load %arg4[%c0_1, %c0_2] : memref<32x256xbf16, #tpu.memory_space<vmem>>, vector<32x256xbf16>
    %cst = arith.constant dense<0.000000e+00> : vector<16x256xf32>
    %2 = tpu.matmul %0, %1, %cst {dimension_numbers = #tpu.dot_dimension_numbers<[1], [0], [0], [1], [0, 0, 1, 1], [], []>} : vector<16x32xbf16>, vector<32x256xbf16>, vector<16x256xf32> -> vector<16x256xf32>
    %3 = vector.extract_strided_slice %2 {offsets = [0, 0], sizes = [16, 128], strides = [1, 1]} : vector<16x256xf32> to vector<16x128xf32>
    %c0_3 = arith.constant 0 : index
    %c0_4 = arith.constant 0 : index
    %4 = vector.load %arg5[%c0_3, %c0_4] : memref<1x128xf32, #tpu.memory_space<vmem>>, vector<1x128xf32>
    %5 = vector.broadcast %4 : vector<1x128xf32> to vector<16x128xf32>
    %6 = arith.addf %3, %5 : vector<16x128xf32>
    %7 = vector.shape_cast %6 : vector<16x128xf32> to vector<2x8x128xf32>
    %c0_5 = arith.constant 0 : index
    %c0_6 = arith.constant 0 : index
    %c0_7 = arith.constant 0 : index
    %8 = vector.load %arg3[%c0_5, %c0_6, %c0_7] : memref<2x8x1xbf16, #tpu.memory_space<vmem>>, vector<2x8x1xbf16>
    %9 = arith.extf %8 : vector<2x8x1xbf16> to vector<2x8x1xf32>
    %10 = vector.broadcast %9 : vector<2x8x1xf32> to vector<2x8x128xf32>
    %11 = arith.addf %7, %10 : vector<2x8x128xf32>
    %12 = vector.extract_strided_slice %2 {offsets = [0, 128], sizes = [16, 128], strides = [1, 1]} : vector<16x256xf32> to vector<16x128xf32>
    %13 = vector.shape_cast %12 : vector<16x128xf32> to vector<2x8x128xf32>
    %cst_8 = arith.constant dense<0xFF800000> : vector<2x128xf32>
    %14 = vector.multi_reduction <maximumf>, %11, %cst_8 [1] : vector<2x8x128xf32> to vector<2x128xf32>
    %15 = vector.shape_cast %14 : vector<2x128xf32> to vector<2x1x128xf32>
    %16 = vector.broadcast %15 : vector<2x1x128xf32> to vector<2x8x128xf32>
    %17 = arith.subf %11, %16 : vector<2x8x128xf32>
    %18 = math.exp %17 : vector<2x8x128xf32>
    %cst_9 = arith.constant dense<0.000000e+00> : vector<2x128xf32>
    %19 = vector.multi_reduction <add>, %18, %cst_9 [1] : vector<2x8x128xf32> to vector<2x128xf32>
    %20 = arith.mulf %18, %13 : vector<2x8x128xf32>
    %cst_10 = arith.constant dense<0.000000e+00> : vector<2x128xf32>
    %21 = vector.multi_reduction <add>, %20, %cst_10 [1] : vector<2x8x128xf32> to vector<2x128xf32>
    %22 = arith.divf %21, %19 : vector<2x128xf32>
    %c0_11 = arith.constant 0 : index
    %c0_12 = arith.constant 0 : index
    %23 = vector.load %arg6[%c0_11, %c0_12] : memref<1x128xf32, #tpu.memory_space<vmem>>, vector<1x128xf32>
    %24 = vector.broadcast %23 : vector<1x128xf32> to vector<2x128xf32>
    %25 = arith.addf %22, %24 : vector<2x128xf32>
    %26 = arith.negf %25 : vector<2x128xf32>
    %27 = math.exp %26 : vector<2x128xf32>
    %cst_13 = arith.constant 1.000000e+00 : f32
    %28 = vector.broadcast %cst_13 : f32 to vector<2x128xf32>
    %29 = arith.addf %28, %27 : vector<2x128xf32>
    %30 = arith.divf %28, %29 : vector<2x128xf32>
    %c0_14 = arith.constant 0 : index
    %c0_15 = arith.constant 0 : index
    %31 = vector.load %arg7[%c0_14, %c0_15] : memref<2x128xf32, #tpu.memory_space<vmem>>, vector<2x128xf32>
    tpu.vector_store %arg7[%c0_14, %c0_15], %30 {strides = array<i32>} : memref<2x128xf32, #tpu.memory_space<vmem>>, vector<2x128xf32>,
    return
  }
  func.func @transform_0(%arg0: i32, %arg1: i32) -> (i32, i32) {
    %c0_i32 = arith.constant 0 : i32
    %c0_i32_0 = arith.constant 0 : i32
    return %arg0, %c0_i32 : i32, i32
  }
  func.func @transform_1(%arg0: i32, %arg1: i32) -> (i32, i32, i32) {
    %c0_i32 = arith.constant 0 : i32
    %c0_i32_0 = arith.constant 0 : i32
    %c0_i32_1 = arith.constant 0 : i32
    return %arg0, %c0_i32, %c0_i32_0 : i32, i32, i32
  }
  func.func @transform_2(%arg0: i32, %arg1: i32) -> (i32, i32) {
    %c0_i32 = arith.constant 0 : i32
    %c0_i32_0 = arith.constant 0 : i32
    return %c0_i32, %arg1 : i32, i32
  }
  func.func @transform_3(%arg0: i32, %arg1: i32) -> (i32, i32) {
    %c0_i32 = arith.constant 0 : i32
    %c0_i32_0 = arith.constant 0 : i32
    return %c0_i32, %arg1 : i32, i32
  }
  func.func @transform_4(%arg0: i32, %arg1: i32) -> (i32, i32) {
    %c0_i32 = arith.constant 0 : i32
    %c0_i32_0 = arith.constant 0 : i32
    return %c0_i32, %arg1 : i32, i32
  }
  func.func @transform_5(%arg0: i32, %arg1: i32) -> (i32, i32) {
    %c0_i32 = arith.constant 0 : i32
    return %arg0, %arg1 : i32, i32
  }
}

</mosaic_0001>

<bundles_post_ra>
// kernel: tpu_custom_call.1
= control target key start
LH: loop header
LB: loop body
LE: loop exit
PB: predicated region body
PF: predicated region fallthrough
CT: control target
= control target key end

     0   :  { %10 = vsyncpa [#allocation3], 0  ;;  %s392_s0 = inlined_call_operand.vmem [shape: bf16[16,32], index: 0, kind: input, shape index: {}]   ;;  %s393_s1 = inlined_call_operand.vmem [shape: bf16[2,8,1], index: 1, kind: input, shape index: {}]   ;;  %s394_s2 = inlined_call_operand.hbm [shape: bf16[32,256], index: 2, kind: input, shape index: {}]   ;;  %s395_s3 = inlined_call_operand.vmem [shape: f32[1,128], index: 3, kind: input, shape index: {}]   ;;  %s396_s4 = inlined_call_operand.vmem [shape: f32[1,128], index: 4, kind: input, shape index: {}]   ;;  %s397_s5 = inlined_call_operand.hbm [shape: f32[2,128], index: 5, kind: output, shape index: {}]  }
   0x1   :  { %11 = vsyncpa [#allocation4], 0  ;;  %s321_s18 = smov [#allocation2]   ;;  %s273_s22 = scalar_lea.hbm %s394_s2, 512 }
   0x2   :  { %s21_s19 = sshll.u32 %s321_s18, 4  ;;  %p274_p0 = scmp.ne.s32.totalorder %s394_s2, %s273_s22  ;;  %s22_s19 = int_to_ptr.vmem [resolvable:$true] %s21_s19 }
   0x3   :  { %p277_p1 = scmp.lt.u32.totalorder %s273_s22, %s394_s2 }
   0x5   :  { %p279_p2 = pnand %p277_p1, %p274_p0 }
   0x7   :  { %282 = shalt.err (!%p279_p2)
}
   0x8   :  { %s283_s27 = scalar_lea.vmem %s22_s19, 512  ;;  %p288_p4 = scmp.lt.s32.totalorder %s22_s19, %s22_s19 }
   0x9   :  { %p284_p3 = scmp.ne.s32.totalorder %s22_s19, %s283_s27  ;;  %p289_p5 = scmp.lt.s32.totalorder %s283_s27, %s283_s27 }
   0xb   :  { %p290_p6 = por %p289_p5, %p288_p4 }
   0xd   :  { %p291_p7 = pnand %p290_p6, %p284_p3 }
   0xf   :  { %294 = shalt.err (!%p291_p7)
}
  0x10   :  { %s322_s28 = smov 128   ;;  %s323_s29 = smov 8  }
  0x11   :  { %27 = dma.hbm_to_vmem [thread:$0]  %s394_s2, 512, %s22_s19, [#allocation3], %s322_s28, %s322_s28, %s323_s29  }
  0x12   :  { %317 = dma.done.wait [#allocation3], 512  }
  0x13   :  { %318 = vsyncadd [#allocation3], 4294966784  ;;  %v324_v0 = vmov 0   ;;  %v250_v1 = vld [vmem:[#allocation2 + $0x4] ss:$8 sps:$4 sm:$0xff]   ;;  %vm67_vm0 = vcmask 261120  }
  0x14   :  { %103 = vmatprep.mubr.bf16.mxu0 %v324_v0  ;;  %249 = vset.pattern.permute.xlu0 %v324_v0  ;;  %v252_v2 = vld [vmem:[#allocation2] ss:$8 sps:$4 sm:$0xff]   ;;  %v253_v3 = vld [vmem:[#allocation2 + $0x14] ss:$8 sps:$4 sm:$0xff]   ;;  %v255_v4 = vld [vmem:[#allocation2 + $0x10] ss:$8 sps:$4 sm:$0xff]  }
  0x15   :  { %71 = vmatprep.subr.bf16.mxu0 %v250_v1  ;;  %v241_v5 = vld [vmem:[%s393_s1] sm:$0xff]   ;;  %vm211_vm1 = vcmask 1041409  }
  0x16   :  { %72 = vmatpush1.bf16.msra.mxu0 %v252_v2  ;;  %v243_v6 = vunpack.c.h.bf16 %v241_v5  ;;  %v256_v7 = vld [vmem:[%s392_s0] sm:$0xff]   ;;  %v242_v8 = vunpack.c.l.bf16 %v241_v5 }
  0x17   :  { %73 = vmatprep.subr.bf16.mxu0 %v253_v3  ;;  %v236_v10 = vld [vmem:[%s395_s3] ss:$0 sm:$0xff]  ;;  %s325_s3 = smov [#allocation5]  }
  0x18   :  { %134 = vperm.xlu0 %249, %v243_v6   ;;  %v237_v0 = vld [vmem:[%s396_s4] ss:$0 sm:$0xff]  ;;  %s221_s12 = sshll.u32 %s325_s3, 4  ;;  %s222_s12 = int_to_ptr.vmem [resolvable:$true] %s221_s12 }
  0x19   :  { %s295_s4 = scalar_lea.vmem %s222_s12, 32  ;;  %p300_p9 = scmp.lt.s32.totalorder %s222_s12, %s222_s12 }
  0x1a   :  { %74 = vmatpush1.bf16.msra.mxu0 %v255_v4  ;;  %p296_p8 = scmp.ne.s32.totalorder %s222_s12, %s295_s4  ;;  %p301_p10 = scmp.lt.s32.totalorder %s295_s4, %s295_s4 }
  0x1c   :  { %129 = vperm.xlu0 %249, %v242_v8   ;;  %p302_p11 = por %p301_p10, %p300_p9 }
  0x1d   :  { %235 = vmatmul.mubr.msk.bf16.vlgmr.msra.gmra.mrb[0].mxu0 %vm67_vm0, %v256_v7 }
  0x1e   :  { %p303_p12 = pnand %p302_p11, %p296_p8 }
  0x97   :  { %v135_v9 = vpop.permute.xlu0 %134 }
  0x9b   :  { %v130_v12 = vpop.permute.xlu0 %129 }
  0xf0   :  { %v105_v11 = vpop.f32.mrb[0].mxu0 }
  0xf1   :  { %v121_v13 = vadd.f32 %v236_v10, %v105_v11  ;;  %v107_v14 = vpop.f32.mrb[1].mxu0 }
  0xf2   :  { %v109_v15 = vpop.f32.mrb[2].mxu0 }
  0xf3   :  { %v137_v16 = vadd.f32 %v130_v12, %v121_v13  ;;  %v122_v17 = vadd.f32 %v236_v10, %v109_v15  ;;  %v111_v18 = vpop.f32.mrb[3].mxu0 }
  0xf5   :  { %v139_v19 = vrot.slane %v137_v16, 4  ;;  %v138_v20 = vadd.f32 %v135_v9, %v122_v17 }
  0xf7   :  { %v140_v21 = vmax.f32 %v137_v16, %v139_v19  ;;  %v145_v22 = vrot.slane %v138_v20, 4 }
  0xf9   :  { %v141_v23 = vrot.slane %v140_v21, 2  ;;  %v146_v24 = vmax.f32 %v138_v20, %v145_v22 }
  0xfb   :  { %v142_v25 = vmax.f32 %v140_v21, %v141_v23  ;;  %v147_v26 = vrot.slane %v146_v24, 2 }
  0xfd   :  { %v143_v27 = vrot.slane %v142_v25, 1  ;;  %v148_v28 = vmax.f32 %v146_v24, %v147_v26 }
  0xff   :  { %v144_v29 = vmax.f32 %v142_v25, %v143_v27  ;;  %v149_v30 = vrot.slane %v148_v28, 1 }
 0x101   :  { %v151_v31 = vsub.f32 %v137_v16, %v144_v29  ;;  %v150_v32 = vmax.f32 %v148_v28, %v149_v30 }
 0x103   :  { %v153_v33 = vmul.f32 1.442695, %v151_v31  ;;  %v152_v34 = vsub.f32 %v138_v20, %v150_v32 }
 0x105   :  { %257 = vpow2.f32 %v153_v33  ;;  %v155_v35 = vmul.f32 1.442695, %v152_v34 }
 0x107   :  { %259 = vpow2.f32 %v155_v35 }
 0x10f   :  { %v258_v36 = vpop.eup %257 }
 0x110   :  { %v157_v37 = vrot.slane %v258_v36, 4  ;;  %v169_v38 = vmul.f32 %v258_v36, %v107_v14 }
 0x111   :  { %v260_v39 = vpop.eup %259 }
 0x112   :  { %v158_v40 = vadd.f32 %v258_v36, %v157_v37  ;;  %v163_v41 = vrot.slane %v260_v39, 4  ;;  %v170_v42 = vmul.f32 %v260_v39, %v111_v18  ;;  %v171_v43 = vrot.slane %v169_v38, 4 }
 0x114   :  { %v159_v44 = vrot.slane %v158_v40, 2  ;;  %v164_v45 = vadd.f32 %v260_v39, %v163_v41  ;;  %v177_v46 = vrot.slane %v170_v42, 4  ;;  %v172_v47 = vadd.f32 %v171_v43, %v169_v38 }
 0x116   :  { %v160_v48 = vadd.f32 %v159_v44, %v158_v40  ;;  %v165_v49 = vrot.slane %v164_v45, 2  ;;  %v178_v50 = vadd.f32 %v177_v46, %v170_v42  ;;  %v173_v53 = vrot.slane %v172_v47, 2 }
 0x118   :  { %v161_v51 = vrot.slane %v160_v48, 1  ;;  %v166_v52 = vadd.f32 %v165_v49, %v164_v45  ;;  %v179_v56 = vrot.slane %v178_v50, 2  ;;  %v174_v58 = vadd.f32 %v173_v53, %v172_v47 }
 0x11a   :  { %v162_v54 = vadd.f32 %v161_v51, %v160_v48  ;;  %v167_v55 = vrot.slane %v166_v52, 1  ;;  %v180_v59 = vadd.f32 %v179_v56, %v178_v50  ;;  %v175_v60 = vrot.slane %v174_v58, 1 }
 0x11c   :  { %v168_v57 = vadd.f32 %v167_v55, %v166_v52  ;;  %261 = vrcp.f32 %v162_v54  ;;  %v181_v61 = vrot.slane %v180_v59, 1  ;;  %v176_v62 = vadd.f32 %v175_v60, %v174_v58 }
 0x11e   :  { %263 = vrcp.f32 %v168_v57  ;;  %v182_v1 = vadd.f32 %v181_v61, %v180_v59 }
 0x126   :  { %v262_v63 = vpop.eup %261 }
 0x127   :  { %v184_v2 = vmul.f32 %v262_v63, %v176_v62 }
 0x128   :  { %v264_v3 = vpop.eup %263 }
 0x129   :  { %v186_v4 = vmul.f32 %v264_v3, %v182_v1  ;;  %v194_v5 = vadd.f32 %v237_v0, %v184_v2 }
 0x12b   :  { %v195_v6 = vadd.f32 %v237_v0, %v186_v4  ;;  %v238_v7 = vmul.f32 -1.442695, %v194_v5 }
 0x12d   :  { %265 = vpow2.f32 %v238_v7  ;;  %v239_v8 = vmul.f32 -1.442695, %v195_v6 }
 0x12f   :  { %267 = vpow2.f32 %v239_v8 }
 0x137   :  { %v266_v9 = vpop.eup %265 }
 0x138   :  { %v202_v11 = vadd.f32 1.0, %v266_v9 }
 0x139   :  { %v268_v10 = vpop.eup %267 }
 0x13a   :  { %v203_v12 = vadd.f32 1.0, %v268_v10 }
 0x13c   :  { %269 = vrcp.f32 %v203_v12 }
 0x13d   :  { %271 = vrcp.f32 %v202_v11 }
 0x146   :  { %v270_v13 = vpop.eup %269 }
 0x147   :  { %v210_v14 = vrot.slane %v270_v13, 7  ;;  %v272_v15 = vpop.eup %271 }
 0x149   :  { %v212_v16 = vsel %vm211_vm1, %v210_v14, %v272_v15 }
 0x14a   :  { %214 = vst [vmem:[#allocation5] sm:$0x3] %v212_v16 }
 0x14b   :  { %306 = shalt.err (!%p303_p12)
}
 0x14c   :  { %s307_s15 = scalar_lea.hbm %s397_s5, 32 }
 0x14d   :  { %p308_p13 = scmp.ne.s32.totalorder %s397_s5, %s307_s15  ;;  %p311_p0 = scmp.lt.u32.totalorder %s307_s15, %s397_s5 }
 0x14f   :  { %p313_p1 = pnand %p311_p0, %p308_p13 }
 0x151   :  { %316 = shalt.err (!%p313_p1)
}
 0x152   :  { %224 = dma.vmem_to_hbm [thread:$0]  %s222_s12, 32, %s397_s5, [#allocation4]  }
 0x153   :  { %319 = dma.done.wait [#allocation4], 32  }
 0x154   :  { %320 = vsyncadd [#allocation4], 4294967264 }
 0x155   :  { %228 = vsyncpa [#allocation3], 1 }
 0x156   :  { %229 = vsyncpa [#allocation4], 1 }

</bundles_post_ra>
